<compile_context>
chip_gen: v5e
topology: v5e:2x2
jax: 0.10.0
libtpu: 0.0.40
codegen_flags: <defaults>
</compile_context>

<pallas_src>
import functools
import math

import jax
import jax.numpy as jnp
from jax.experimental import pallas as pl
from jax.experimental.pallas import tpu as pltpu


def _scale_kernel(x_ref, m_ref, o_ref):
    """x_ref/o_ref: (TM, C) lane-dense tile; m_ref: (1, C) resident multiplier row."""
    o_ref[...] = x_ref[...] * m_ref[...]          # broadcast over sublanes


def _round_up(x, m):
    return ((x + m - 1) // m) * m


def _plan(L, D, itemsize):
    """Plan the [M_pad, C] view / (TM, C) row-blocking of a length-L flat array.

    C is a multiple of 128 (dense lanes, unmasked vst) and of D (so the
    per-lane multiplier pattern is identical for every row).  Returns
    (M_pad, C, TM); padding is needed only when M_pad * C > L.
    """
    sub = 8 * max(1, 4 // itemsize)                    # sublane granularity (8/16/32)
    C = (128 * D) // math.gcd(128, D)                  # lcm(128, D)
    M = -(-L // C)                                     # rows needed
    # ~2 MiB row blocks: streaming sweet spot; 2x double-buffered in+out ~8 MiB
    # fits the default scoped VMEM of every generation (incl. v5e's 16 MiB).
    max_tm = max(sub, ((2 << 20) // (C * itemsize)) // sub * sub)

    if L == M * C and M % sub == 0:
        # Exact fit, zero padding: largest sub*2^k row block dividing M.
        TM = sub
        while TM * 2 <= min(M, max_tm) and M % (TM * 2) == 0:
            TM *= 2
        if M == TM and TM >= 2 * sub and (TM // 2) % sub == 0:
            TM //= 2                                   # >=2 grid steps for v7x megacore
        return M, C, TM

    if L == M * C and M * C * itemsize <= (4 << 20):
        # Small tensor whose row count isn't a multiple of `sub`: one block whose
        # sublane dim equals the full array dim (legal), still zero padding.
        return M, C, M

    # General case: pad rows up to a multiple of the row-block size.
    TM = min(max_tm, _round_up(M, sub))
    if _round_up(M, TM) == TM and TM >= 2 * sub and (TM // 2) % sub == 0:
        TM //= 2                                       # prefer >=2 grid steps
    M_pad = _round_up(M, TM)
    return M_pad, C, TM


def scale_objects(objects, scale=4):
    """Pallas TPU implementation of ScaleObjects.forward (functional)."""
    B, N, D = objects.shape
    assert D >= 4, "need at least 4 box-coordinate entries in the last dim"
    dtype = objects.dtype
    itemsize = jnp.dtype(dtype).itemsize

    L = B * N * D
    M_pad, C, TM = _plan(L, D, itemsize)
    P = M_pad * C
    grid_m = M_pad // TM

    # Dense [M_pad, C] view of the flattened tensor (pad only if required).
    flat = objects.reshape(-1)
    if P != L:
        flat = jnp.pad(flat, (0, P - L))
    x2d = flat.reshape(M_pad, C)

    # Per-lane multiplier row: period D = [scale]*4 + [1]*(D-4), tiled across C.
    period = jnp.concatenate(
        [jnp.full((4,), scale, dtype=dtype), jnp.ones((D - 4,), dtype=dtype)]
    )
    mult = jnp.tile(period, C // D).reshape(1, C)

    out2d = pl.pallas_call(
        _scale_kernel,
        out_shape=jax.ShapeDtypeStruct((M_pad, C), dtype),
        grid_spec=pltpu.PrefetchScalarGridSpec(
            num_scalar_prefetch=0,
            grid=(grid_m,),
            in_specs=[
                pl.BlockSpec((TM, C), lambda m: (m, 0)),   # streamed data tile
                pl.BlockSpec((1, C), lambda m: (0, 0)),    # resident multiplier row
            ],
            out_specs=pl.BlockSpec((TM, C), lambda m: (m, 0)),
        ),
        compiler_params=pltpu.CompilerParams(
            dimension_semantics=("parallel",),
        ),
        cost_estimate=pl.CostEstimate(
            flops=B * N * D,                     # one multiply per element
            transcendentals=0,
            bytes_accessed=2 * L * itemsize,     # read + write everything once
        ),
    )(x2d, mult)

    return out2d.reshape(-1)[:L].reshape(B, N, D)


def scale_objects_ref(objects, scale=4):
    """Pure-JAX reference mirroring the PyTorch in-place update (functionally)."""
    return jnp.concatenate([objects[..., :4] * scale, objects[..., 4:]], axis=-1)


if __name__ == "__main__":
    key = jax.random.PRNGKey(0)
    B, N, D = 2, 128, 6                          # [batch, num objects, 4 box + class + score]
    objects = jax.random.normal(key, (B, N, D), dtype=jnp.float32)

    fn = jax.jit(functools.partial(scale_objects, scale=4))
    out = jax.block_until_ready(fn(objects))
    ref = scale_objects_ref(objects, scale=4)

    assert out.shape == objects.shape and out.dtype == objects.dtype
    if not bool(jnp.allclose(out, ref)):
        raise AssertionError("Pallas ScaleObjects output mismatches reference")
    print("KERNEL_OK")
</pallas_src>

<mosaic_0001>
module attributes {stable_mosaic.version = 11 : i64} {
  func.func @_scale_kernel(%arg0: i32, %arg1: memref<4x384xf32, #tpu.memory_space<vmem>>, %arg2: memref<1x384xf32, #tpu.memory_space<vmem>>, %arg3: memref<4x384xf32, #tpu.memory_space<vmem>>) attributes {dimension_semantics = [#tpu.dimension_semantics<parallel>], iteration_bounds = array<i64: 1>, scalar_prefetch = 0 : i64, scratch_operands = 0 : i64, tpu.core_type = #tpu.core_type<tc>, window_params = [{transform_indices = @transform_0, window_bounds = array<i64: 4, 384>}, {pipeline_mode = #tpu.pipeline_mode<synchronous>, transform_indices = @transform_1, window_bounds = array<i64: 1, 384>}, {transform_indices = @transform_2, window_bounds = array<i64: 4, 384>}]} {
    %c0 = arith.constant 0 : index
    %c0_0 = arith.constant 0 : index
    %0 = vector.load %arg1[%c0, %c0_0] : memref<4x384xf32, #tpu.memory_space<vmem>>, vector<4x384xf32>
    %c0_1 = arith.constant 0 : index
    %c0_2 = arith.constant 0 : index
    %1 = vector.load %arg2[%c0_1, %c0_2] : memref<1x384xf32, #tpu.memory_space<vmem>>, vector<1x384xf32>
    %2 = vector.broadcast %1 : vector<1x384xf32> to vector<4x384xf32>
    %3 = arith.mulf %0, %2 : vector<4x384xf32>
    %c0_3 = arith.constant 0 : index
    %c0_4 = arith.constant 0 : index
    %4 = vector.load %arg3[%c0_3, %c0_4] : memref<4x384xf32, #tpu.memory_space<vmem>>, vector<4x384xf32>
    tpu.vector_store %arg3[%c0_3, %c0_4], %3 {strides = array<i32>} : memref<4x384xf32, #tpu.memory_space<vmem>>, vector<4x384xf32>,
    return
  }
  func.func @transform_0(%arg0: i32) -> (i32, i32) {
    %c0_i32 = arith.constant 0 : i32
    %c0_i32_0 = arith.constant 0 : i32
    return %arg0, %c0_i32 : i32, i32
  }
  func.func @transform_1(%arg0: i32) -> (i32, i32) {
    %c0_i32 = arith.constant 0 : i32
    %c0_i32_0 = arith.constant 0 : i32
    %c0_i32_1 = arith.constant 0 : i32
    return %c0_i32, %c0_i32_0 : i32, i32
  }
  func.func @transform_2(%arg0: i32) -> (i32, i32) {
    %c0_i32 = arith.constant 0 : i32
    %c0_i32_0 = arith.constant 0 : i32
    return %arg0, %c0_i32 : i32, i32
  }
}

</mosaic_0001>

<bundles_post_ra>
// kernel: tile.7
= control target key start
LH: loop header
LB: loop body
LE: loop exit
PB: predicated region body
PF: predicated region fallthrough
CT: control target
= control target key end

     0   :  { %vm9_vm0 = vcmask 15360   ;;  %s587_s10 = smov 122   ;;  %s588_s13 = smov 126   ;;  %vm13_vm1 = vcmask 31744   ;;  %vm3_vm2 = vcmask 48128   ;;  %vm16_vm3 = vcmask 1048560   ;;  %s871_s0 = inlined_call_operand.vmem [shape: f32[64,6], index: 0, kind: input, shape index: {}]   ;;  %s872_s1 = inlined_call_operand.vmem [shape: f32[1,384], index: 1, kind: output, shape index: {}]  }
   0x1   :  { %v461_v0 = vld [vmem:[%s871_s0 + $0x3f] sm:$0x1]   ;;  %v457_v1 = vld [vmem:[%s871_s0 + $0x15] sm:$0x1]   ;;  %v463_v4 = vld [vmem:[%s871_s0 + $0x29] sm:$0x1]  }
   0x2   :  { %34 = vrot.lane.b32.xlu1 %v461_v0, %s587_s10  ;;  %v458_v2 = vld [vmem:[%s871_s0 + $0x15] sm:$0x1]   ;;  %v459_v5 = vld [vmem:[%s871_s0 + $0x2a] sm:$0x1]   ;;  %s589_s20 = smov 118   ;;  %s590_s23 = smov 120  }
   0x3   :  { %v10_v3 = vsel %vm9_vm0, %v458_v2, %v457_v1  ;;  %v460_v6 = vld [vmem:[%s871_s0 + $0x2a] sm:$0x1]   ;;  %47 = vrot.lane.b32.xlu2 %v463_v4, %s589_s20  ;;  %v462_v7 = vld [vmem:[%s871_s0 + $0x14] sm:$0x1]   ;;  %v464_v9 = vld [vmem:[%s871_s0 + $0x3e] sm:$0x1]  }
   0x4   :  { %11 = vrot.lane.b32.xlu0 %v10_v3, %s588_s13  ;;  %v23_v8 = vsel %vm13_vm1, %v460_v6, %v459_v5  ;;  %s591_s26 = smov 124   ;;  %s592_s27 = smov 116   ;;  %v466_v10 = vld [vmem:[%s871_s0 + $0x28] sm:$0x1]   ;;  %v465_v11 = vld [vmem:[%s871_s0 + $0x13] sm:$0x1]  }
   0x5   :  { %s593_s3 = smov 112   ;;  %v467_v12 = vld [vmem:[%s871_s0 + $0x3d] sm:$0x1]   ;;  %s594_s6 = smov 114   ;;  %v469_v13 = vld [vmem:[%s871_s0 + $0x27] sm:$0x1]  }
   0x6   :  { %s595_s7 = smov 110   ;;  %v468_v14 = vld [vmem:[%s871_s0 + $0x12] sm:$0x1]   ;;  %s596_s12 = smov 106   ;;  %v470_v15 = vld [vmem:[%s871_s0 + $0x3c] sm:$0x1]  }
   0x7   :  { %s597_s15 = smov 108   ;;  %s598_s16 = smov 104   ;;  %v472_v16 = vld [vmem:[%s871_s0 + $0x26] sm:$0x1]   ;;  %v471_v17 = vld [vmem:[%s871_s0 + $0x11] sm:$0x1]  }
   0x8   :  { %s599_s21 = smov 100   ;;  %v473_v18 = vld [vmem:[%s871_s0 + $0x3b] sm:$0x1]   ;;  %s600_s24 = smov 102   ;;  %v475_v19 = vld [vmem:[%s871_s0 + $0x25] sm:$0x1]  }
   0x9   :  { %s601_s25 = smov 98   ;;  %v474_v20 = vld [vmem:[%s871_s0 + $0x10] sm:$0x1]   ;;  %s602_s30 = smov 94   ;;  %v476_v21 = vld [vmem:[%s871_s0 + $0x3a] sm:$0x1]  }
   0xa   :  { %41 = vrot.lane.b32.xlu1 %v462_v7, %s590_s23  ;;  %s603_s4 = smov 96   ;;  %s604_s5 = smov 92   ;;  %v478_v22 = vld [vmem:[%s871_s0 + $0x24] sm:$0x1]   ;;  %v477_v23 = vld [vmem:[%s871_s0 + $0xf] sm:$0x1]  }
   0xb   :  { %54 = vrot.lane.b32.xlu2 %v464_v9, %s592_s27  ;;  %s605_s10 = smov 88   ;;  %v479_v24 = vld [vmem:[%s871_s0 + $0x39] sm:$0x1]   ;;  %s606_s13 = smov 90   ;;  %v481_v25 = vld [vmem:[%s871_s0 + $0x23] sm:$0x1]  }
   0xc   :  { %24 = vrot.lane.b32.xlu0 %v23_v8, %s591_s26  ;;  %s607_s14 = smov 86   ;;  %v480_v26 = vld [vmem:[%s871_s0 + $0xe] sm:$0x1]   ;;  %s608_s19 = smov 82   ;;  %v482_v27 = vld [vmem:[%s871_s0 + $0x38] sm:$0x1]  }
   0xd   :  { %s609_s22 = smov 84   ;;  %s610_s23 = smov 80   ;;  %v484_v28 = vld [vmem:[%s871_s0 + $0x22] sm:$0x1]   ;;  %v483_v29 = vld [vmem:[%s871_s0 + $0xd] sm:$0x1]  }
   0xe   :  { %s611_s28 = smov 76   ;;  %v485_v30 = vld [vmem:[%s871_s0 + $0x37] sm:$0x1]   ;;  %s612_s2 = smov 78   ;;  %v487_v31 = vld [vmem:[%s871_s0 + $0x21] sm:$0x1]  }
   0xf   :  { %v486_v32 = vld [vmem:[%s871_s0 + $0xc] sm:$0x1]   ;;  %s614_s8 = smov 70   ;;  %v488_v33 = vld [vmem:[%s871_s0 + $0x36] sm:$0x1]   ;;  %s615_s11 = smov 72  }
  0x10   :  { %v490_v34 = vld [vmem:[%s871_s0 + $0x20] sm:$0x1]   ;;  %v489_v35 = vld [vmem:[%s871_s0 + $0xb] sm:$0x1]   ;;  %s617_s17 = smov 64   ;;  %s618_s20 = smov 66  }
  0x11   :  { %v491_v36 = vld [vmem:[%s871_s0 + $0x35] sm:$0x1]   ;;  %v2_v37 = vld [vmem:[%s871_s0] sm:$0x1]   ;;  %v493_v38 = vld [vmem:[%s871_s0 + $0x1f] sm:$0x1]  }
  0x12   :  { %67 = vrot.lane.b32.xlu1 %v466_v10, %s593_s3  ;;  %s613_s3 = smov 74   ;;  %4 = vst.msk [vmem:[#allocation0] sm:$0x1] %vm3_vm2, %v2_v37   ;;  %v492_v39 = vld [vmem:[%s871_s0 + $0xa] sm:$0x1]   ;;  %s629_s26 = smov 40  }
  0x13   :  { %74 = vrot.lane.b32.xlu2 %v467_v12, %s595_s7  ;;  %v494_v40 = vld [vmem:[%s871_s0 + $0x34] sm:$0x1]   ;;  %v496_v41 = vld [vmem:[%s871_s0 + $0x1e] sm:$0x1]   ;;  %v495_v43 = vld [vmem:[%s871_s0 + $0x9] sm:$0x1]  }
  0x14   :  { %61 = vrot.lane.b32.xlu0 %v465_v11, %s594_s6  ;;  %v497_v44 = vld [vmem:[%s871_s0 + $0x33] sm:$0x1]   ;;  %v499_v45 = vld [vmem:[%s871_s0 + $0x1d] sm:$0x1]   ;;  %v498_v47 = vld [vmem:[%s871_s0 + $0x8] sm:$0x1]  }
  0x15   :  { %v500_v48 = vld [vmem:[%s871_s0 + $0x32] sm:$0x1]   ;;  %v502_v49 = vld [vmem:[%s871_s0 + $0x1c] sm:$0x1]   ;;  %v501_v51 = vld [vmem:[%s871_s0 + $0x7] sm:$0x1]  }
  0x16   :  { %v503_v52 = vld [vmem:[%s871_s0 + $0x31] sm:$0x1]   ;;  %s630_s29 = smov 42   ;;  %v505_v55 = vld [vmem:[%s871_s0 + $0x1b] sm:$0x1]   ;;  %s632_s6 = smov 34  }
  0x17   :  { %v504_v57 = vld [vmem:[%s871_s0 + $0x6] sm:$0x1]   ;;  %vm43_vm4 = vcmask 1032128   ;;  %v506_v58 = vld [vmem:[%s871_s0 + $0x30] sm:$0x1]   ;;  %s633_s9 = smov 36  }
  0x18   :  { %vm29_vm5 = vcmask 1048544   ;;  %vm36_vm6 = vcmask 1048528   ;;  %vm49_vm7 = vcmask 1015728   ;;  %v508_v61 = vld [vmem:[%s871_s0 + $0x1a] sm:$0x1]   ;;  %vm56_vm8 = vcmask 999328  }
  0x19   :  { %v507_v63 = vld [vmem:[%s871_s0 + $0x5] sm:$0x1]   ;;  %vm76_vm9 = vcmask 950128   ;;  %vm69_vm10 = vcmask 966528   ;;  %vm96_vm11 = vcmask 900928   ;;  %s636_s18 = smov 30  }
  0x1a   :  { %87 = vrot.lane.b32.xlu1 %v469_v13, %s596_s12  ;;  %s616_s12 = smov 68   ;;  %v509_v0 = vld [vmem:[%s871_s0 + $0x2f] sm:$0x1]   ;;  %vm63_vm12 = vcmask 982928   ;;  %vm116_vm13 = vcmask 851728   ;;  %vm136_vm14 = vcmask 802528  }
  0x1b   :  { %94 = vrot.lane.b32.xlu2 %v470_v15, %s598_s16  ;;  %v511_v3 = vld [vmem:[%s871_s0 + $0x19] sm:$0x1]   ;;  %v510_v5 = vld [vmem:[%s871_s0 + $0x4] sm:$0x1]   ;;  %vm89_vm15 = vcmask 917328   ;;  %s639_s27 = smov 24  }
  0x1c   :  { %81 = vrot.lane.b32.xlu0 %v468_v14, %s597_s15  ;;  %s635_s15 = smov 28   ;;  %v512_v6 = vld [vmem:[%s871_s0 + $0x2e] sm:$0x1]   ;;  %v514_v9 = vld [vmem:[%s871_s0 + $0x18] sm:$0x1]   ;;  %vm109_vm2 = vcmask 868128  }
  0x1d   :  { %v513_v11 = vld [vmem:[%s871_s0 + $0x3] sm:$0x1]   ;;  %v515_v12 = vld [vmem:[%s871_s0 + $0x2d] sm:$0x1]   ;;  %s642_s7 = smov 18   ;;  %s645_s16 = smov 12  }
  0x1e   :  { %v517_v15 = vld [vmem:[%s871_s0 + $0x17] sm:$0x1]  }
  0x22   :  { %107 = vrot.lane.b32.xlu1 %v472_v16, %s599_s21  ;;  %s628_s21 = smov 44  }
  0x23   :  { %114 = vrot.lane.b32.xlu2 %v473_v18, %s601_s25  ;;  %v518_v18 = vld [vmem:[%s871_s0 + $0x2c] sm:$0x1]   ;;  %s649_s25 = smov 2  }
  0x24   :  { %101 = vrot.lane.b32.xlu0 %v471_v17, %s600_s24  ;;  %s638_s24 = smov 22   ;;  %v516_v17 = vld [vmem:[%s871_s0 + $0x2] sm:$0x1]  }
  0x2a   :  { %127 = vrot.lane.b32.xlu1 %v475_v19, %s602_s30  ;;  %s631_s30 = smov 38  }
  0x2b   :  { %134 = vrot.lane.b32.xlu2 %v476_v21, %s604_s5  ;;  %v520_v21 = vld [vmem:[%s871_s0 + $0x16] sm:$0x1]  }
  0x2c   :  { %121 = vrot.lane.b32.xlu0 %v474_v20, %s603_s4  ;;  %s641_s4 = smov 16  }
  0x32   :  { %147 = vrot.lane.b32.xlu1 %v478_v22, %s605_s10  ;;  %s634_s10 = smov 32  }
  0x33   :  { %154 = vrot.lane.b32.xlu2 %v479_v24, %s607_s14  ;;  %v521_v24 = vld [vmem:[%s871_s0 + $0x2b] sm:$0x1]  }
  0x34   :  { %141 = vrot.lane.b32.xlu0 %v477_v23, %s606_s13  ;;  %s644_s13 = smov 10   ;;  %v519_v23 = vld [vmem:[%s871_s0 + $0x1] sm:$0x1]   ;;  %s648_s0 = smov 6  }
  0x3a   :  { %167 = vrot.lane.b32.xlu1 %v481_v25, %s608_s19  ;;  %s637_s19 = smov 26  }
  0x3b   :  { %174 = vrot.lane.b32.xlu2 %v482_v27, %s610_s23  ;;  %s619_s23 = smov 62  }
  0x3c   :  { %161 = vrot.lane.b32.xlu0 %v480_v26, %s609_s22  ;;  %s647_s22 = smov 4  }
  0x42   :  { %187 = vrot.lane.b32.xlu1 %v484_v28, %s611_s28  ;;  %s620_s28 = smov 58  }
  0x43   :  { %194 = vrot.lane.b32.xlu2 %v485_v30, %s613_s3  ;;  %s622_s3 = smov 56  }
  0x44   :  { %181 = vrot.lane.b32.xlu0 %v483_v29, %s612_s2  ;;  %s621_s2 = smov 60  }
  0x4a   :  { %207 = vrot.lane.b32.xlu1 %v487_v31, %s614_s8  ;;  %s623_s8 = smov 52  }
  0x4b   :  { %214 = vrot.lane.b32.xlu2 %v488_v33, %s616_s12  ;;  %s625_s12 = smov 50  }
  0x4c   :  { %201 = vrot.lane.b32.xlu0 %v486_v32, %s615_s11  ;;  %s624_s11 = smov 54  }
  0x52   :  { %227 = vrot.lane.b32.xlu1 %v490_v34, %s617_s17  ;;  %s626_s17 = smov 46  }
  0x53   :  { %234 = vrot.lane.b32.xlu2 %v491_v36, %s619_s23 }
  0x54   :  { %221 = vrot.lane.b32.xlu0 %v489_v35, %s618_s20  ;;  %s627_s20 = smov 48  }
  0x5a   :  { %247 = vrot.lane.b32.xlu1 %v493_v38, %s620_s28  ;;  %s640_s28 = smov 20  }
  0x5b   :  { %254 = vrot.lane.b32.xlu2 %v494_v40, %s622_s3 }
  0x5c   :  { %241 = vrot.lane.b32.xlu0 %v492_v39, %s621_s2 }
  0x5d   :  { %v48_v42 = vpop.permute.xlu2 %47  }
  0x62   :  { %267 = vrot.lane.b32.xlu1 %v496_v41, %s623_s8  ;;  %s643_s8 = smov 14  }
  0x63   :  { %274 = vrot.lane.b32.xlu2 %v497_v44, %s625_s12 }
  0x64   :  { %261 = vrot.lane.b32.xlu0 %v495_v43, %s624_s11 }
  0x65   :  { %v55_v46 = vpop.permute.xlu2 %54  }
  0x6a   :  { %287 = vrot.lane.b32.xlu1 %v499_v45, %s626_s17  ;;  %s646_s17 = smov 8  }
  0x6b   :  { %294 = vrot.lane.b32.xlu2 %v500_v48, %s628_s21 }
  0x6c   :  { %281 = vrot.lane.b32.xlu0 %v498_v47, %s627_s20 }
  0x6d   :  { %v75_v50 = vpop.permute.xlu2 %74  }
  0x72   :  { %307 = vrot.lane.b32.xlu1 %v502_v49, %s629_s26 }
  0x73   :  { %314 = vrot.lane.b32.xlu2 %v503_v52, %s631_s30 }
  0x74   :  { %301 = vrot.lane.b32.xlu0 %v501_v51, %s630_s29  ;;  %v35_v53 = vpop.permute.xlu1 %34  }
  0x75   :  { %v95_v56 = vpop.permute.xlu2 %94  }
  0x76   :  { %v12_v54 = vpop.permute.xlu0 %11  }
  0x77   :  { %15 = vst.msk [vmem:[#allocation0 + $0x8] sm:$0x1] %vm13_vm1, %v12_v54   ;;  %vm156_vm1 = vcmask 753328  }
  0x78   :  { %17 = vst.msk [vmem:[#allocation0] sm:$0x1] %vm16_vm3, %v12_v54   ;;  %vm103_vm3 = vcmask 884528  }
  0x7a   :  { %327 = vrot.lane.b32.xlu1 %v505_v55, %s632_s6 }
  0x7b   :  { %334 = vrot.lane.b32.xlu2 %v506_v58, %s634_s10 }
  0x7c   :  { %321 = vrot.lane.b32.xlu0 %v504_v57, %s633_s9  ;;  %v42_v59 = vpop.permute.xlu1 %41  }
  0x7d   :  { %44 = vst.msk [vmem:[#allocation0] sm:$0x1] %vm43_vm4, %v42_v59   ;;  %v115_v62 = vpop.permute.xlu2 %114   ;;  %vm176_vm4 = vcmask 704128  }
  0x7e   :  { %v25_v60 = vpop.permute.xlu0 %24  }
  0x7f   :  { %28 = vst.msk [vmem:[#allocation0 + $0x10] sm:$0x1] %vm9_vm0, %v25_v60   ;;  %vm83_vm0 = vcmask 933728  }
  0x80   :  { %31 = vst.msk [vmem:[#allocation0 + $0x8] sm:$0x1] %vm29_vm5, %v25_v60   ;;  %vm129_vm5 = vcmask 818928  }
  0x81   :  { %38 = vst.msk [vmem:[#allocation0 + $0x10] sm:$0x1] %vm36_vm6, %v35_v53   ;;  %vm123_vm6 = vcmask 835328  }
  0x82   :  { %51 = vst.msk [vmem:[#allocation0 + $0x8] sm:$0x1] %vm49_vm7, %v48_v42   ;;  %347 = vrot.lane.b32.xlu1 %v508_v61, %s635_s15  ;;  %vm196_vm7 = vcmask 654928  }
  0x83   :  { %58 = vst.msk [vmem:[#allocation0 + $0x10] sm:$0x1] %vm56_vm8, %v55_v46   ;;  %354 = vrot.lane.b32.xlu2 %v509_v0, %s637_s19  ;;  %vm149_vm8 = vcmask 769728  }
  0x84   :  { %341 = vrot.lane.b32.xlu0 %v507_v63, %s636_s18  ;;  %78 = vst.msk [vmem:[#allocation0 + $0x10] sm:$0x1] %vm76_vm9, %v75_v50   ;;  %v68_v1 = vpop.permute.xlu1 %67   ;;  %vm143_vm9 = vcmask 786128  }
  0x85   :  { %71 = vst.msk [vmem:[#allocation0 + $0x8] sm:$0x1] %vm69_vm10, %v68_v1   ;;  %v135_v4 = vpop.permute.xlu2 %134   ;;  %vm216_vm10 = vcmask 605728  }
  0x86   :  { %v62_v2 = vpop.permute.xlu0 %61   ;;  %98 = vst.msk [vmem:[#allocation0 + $0x10] sm:$0x1] %vm96_vm11, %v95_v56   ;;  %vm169_vm11 = vcmask 720528  }
  0x87   :  { %64 = vst.msk [vmem:[#allocation0] sm:$0x1] %vm63_vm12, %v62_v2   ;;  %vm163_vm12 = vcmask 736928  }
  0x88   :  { %118 = vst.msk [vmem:[#allocation0 + $0x10] sm:$0x1] %vm116_vm13, %v115_v62   ;;  %vm236_vm13 = vcmask 556528  }
  0x89   :  { %138 = vst.msk [vmem:[#allocation0 + $0x10] sm:$0x1] %vm136_vm14, %v135_v4   ;;  %vm189_vm14 = vcmask 671328  }
  0x8a   :  { %367 = vrot.lane.b32.xlu1 %v511_v3, %s638_s24 }
  0x8b   :  { %374 = vrot.lane.b32.xlu2 %v512_v6, %s640_s28 }
  0x8c   :  { %361 = vrot.lane.b32.xlu0 %v510_v5, %s639_s27  ;;  %v88_v7 = vpop.permute.xlu1 %87  }
  0x8d   :  { %91 = vst.msk [vmem:[#allocation0 + $0x8] sm:$0x1] %vm89_vm15, %v88_v7   ;;  %v155_v10 = vpop.permute.xlu2 %154   ;;  %vm183_vm15 = vcmask 687728  }
  0x8e   :  { %v82_v8 = vpop.permute.xlu0 %81   ;;  %158 = vst.msk [vmem:[#allocation0 + $0x10] sm:$0x1] %vm156_vm1, %v155_v10   ;;  %vm209_vm1 = vcmask 622128  }
  0x8f   :  { %84 = vst.msk [vmem:[#allocation0] sm:$0x1] %vm83_vm0, %v82_v8   ;;  %vm256_vm0 = vcmask 507328  }
  0x92   :  { %387 = vrot.lane.b32.xlu1 %v514_v9, %s641_s4 }
  0x93   :  { %394 = vrot.lane.b32.xlu2 %v515_v12, %s643_s8 }
  0x94   :  { %381 = vrot.lane.b32.xlu0 %v513_v11, %s642_s7  ;;  %v108_v13 = vpop.permute.xlu1 %107  }
  0x95   :  { %111 = vst.msk [vmem:[#allocation0 + $0x8] sm:$0x1] %vm109_vm2, %v108_v13   ;;  %v175_v16 = vpop.permute.xlu2 %174   ;;  %vm203_vm2 = vcmask 638528  }
  0x96   :  { %v102_v14 = vpop.permute.xlu0 %101   ;;  %178 = vst.msk [vmem:[#allocation0 + $0x10] sm:$0x1] %vm176_vm4, %v175_v16   ;;  %vm229_vm4 = vcmask 572928  }
  0x97   :  { %104 = vst.msk [vmem:[#allocation0] sm:$0x1] %vm103_vm3, %v102_v14   ;;  %vm276_vm3 = vcmask 458128  }
  0x9a   :  { %407 = vrot.lane.b32.xlu1 %v517_v15, %s644_s13 }
  0x9b   :  { %414 = vrot.lane.b32.xlu2 %v518_v18, %s646_s17 }
  0x9c   :  { %401 = vrot.lane.b32.xlu0 %v516_v17, %s645_s16  ;;  %v128_v19 = vpop.permute.xlu1 %127  }
  0x9d   :  { %131 = vst.msk [vmem:[#allocation0 + $0x8] sm:$0x1] %vm129_vm5, %v128_v19   ;;  %v195_v22 = vpop.permute.xlu2 %194   ;;  %vm223_vm5 = vcmask 589328  }
  0x9e   :  { %v122_v20 = vpop.permute.xlu0 %121   ;;  %198 = vst.msk [vmem:[#allocation0 + $0x10] sm:$0x1] %vm196_vm7, %v195_v22   ;;  %vm249_vm7 = vcmask 523728  }
  0x9f   :  { %124 = vst.msk [vmem:[#allocation0] sm:$0x1] %vm123_vm6, %v122_v20   ;;  %vm296_vm6 = vcmask 408928  }
  0xa2   :  { %427 = vrot.lane.b32.xlu1 %v520_v21, %s647_s22 }
  0xa3   :  { %434 = vrot.lane.b32.xlu2 %v521_v24, %s649_s25 }
  0xa4   :  { %421 = vrot.lane.b32.xlu0 %v519_v23, %s648_s0  ;;  %v148_v25 = vpop.permute.xlu1 %147  }
  0xa5   :  { %151 = vst.msk [vmem:[#allocation0 + $0x8] sm:$0x1] %vm149_vm8, %v148_v25   ;;  %v215_v27 = vpop.permute.xlu2 %214   ;;  %vm243_vm8 = vcmask 540128  }
  0xa6   :  { %v142_v26 = vpop.permute.xlu0 %141   ;;  %218 = vst.msk [vmem:[#allocation0 + $0x10] sm:$0x1] %vm216_vm10, %v215_v27   ;;  %vm269_vm10 = vcmask 474528  }
  0xa7   :  { %144 = vst.msk [vmem:[#allocation0] sm:$0x1] %vm143_vm9, %v142_v26   ;;  %vm316_vm9 = vcmask 359728  }
  0xac   :  { %v168_v28 = vpop.permute.xlu1 %167  }
  0xad   :  { %171 = vst.msk [vmem:[#allocation0 + $0x8] sm:$0x1] %vm169_vm11, %v168_v28   ;;  %v235_v30 = vpop.permute.xlu2 %234   ;;  %vm263_vm11 = vcmask 490928  }
  0xae   :  { %v162_v29 = vpop.permute.xlu0 %161   ;;  %238 = vst.msk [vmem:[#allocation0 + $0x10] sm:$0x1] %vm236_vm13, %v235_v30   ;;  %vm289_vm13 = vcmask 425328  }
  0xaf   :  { %164 = vst.msk [vmem:[#allocation0] sm:$0x1] %vm163_vm12, %v162_v29   ;;  %vm336_vm12 = vcmask 310528  }
  0xb4   :  { %v188_v31 = vpop.permute.xlu1 %187  }
  0xb5   :  { %191 = vst.msk [vmem:[#allocation0 + $0x8] sm:$0x1] %vm189_vm14, %v188_v31   ;;  %v255_v33 = vpop.permute.xlu2 %254   ;;  %vm283_vm14 = vcmask 441728  }
  0xb6   :  { %v182_v32 = vpop.permute.xlu0 %181   ;;  %258 = vst.msk [vmem:[#allocation0 + $0x10] sm:$0x1] %vm256_vm0, %v255_v33   ;;  %vm309_vm0 = vcmask 376128  }
  0xb7   :  { %184 = vst.msk [vmem:[#allocation0] sm:$0x1] %vm183_vm15, %v182_v32   ;;  %vm356_vm15 = vcmask 261328  }
  0xbc   :  { %v208_v34 = vpop.permute.xlu1 %207  }
  0xbd   :  { %211 = vst.msk [vmem:[#allocation0 + $0x8] sm:$0x1] %vm209_vm1, %v208_v34   ;;  %v275_v36 = vpop.permute.xlu2 %274   ;;  %vm303_vm1 = vcmask 392528  }
  0xbe   :  { %v202_v35 = vpop.permute.xlu0 %201   ;;  %278 = vst.msk [vmem:[#allocation0 + $0x10] sm:$0x1] %vm276_vm3, %v275_v36   ;;  %vm329_vm3 = vcmask 326928  }
  0xbf   :  { %204 = vst.msk [vmem:[#allocation0] sm:$0x1] %vm203_vm2, %v202_v35   ;;  %vm376_vm2 = vcmask 212128  }
  0xc4   :  { %v228_v37 = vpop.permute.xlu1 %227  }
  0xc5   :  { %231 = vst.msk [vmem:[#allocation0 + $0x8] sm:$0x1] %vm229_vm4, %v228_v37   ;;  %v295_v39 = vpop.permute.xlu2 %294   ;;  %vm323_vm4 = vcmask 343328  }
  0xc6   :  { %v222_v38 = vpop.permute.xlu0 %221   ;;  %298 = vst.msk [vmem:[#allocation0 + $0x10] sm:$0x1] %vm296_vm6, %v295_v39   ;;  %vm349_vm6 = vcmask 277728  }
  0xc7   :  { %224 = vst.msk [vmem:[#allocation0] sm:$0x1] %vm223_vm5, %v222_v38   ;;  %vm396_vm5 = vcmask 162928  }
  0xcc   :  { %v248_v40 = vpop.permute.xlu1 %247  }
  0xcd   :  { %251 = vst.msk [vmem:[#allocation0 + $0x8] sm:$0x1] %vm249_vm7, %v248_v40   ;;  %v315_v42 = vpop.permute.xlu2 %314   ;;  %vm343_vm7 = vcmask 294128  }
  0xce   :  { %v242_v41 = vpop.permute.xlu0 %241   ;;  %318 = vst.msk [vmem:[#allocation0 + $0x10] sm:$0x1] %vm316_vm9, %v315_v42   ;;  %vm369_vm9 = vcmask 228528  }
  0xcf   :  { %244 = vst.msk [vmem:[#allocation0] sm:$0x1] %vm243_vm8, %v242_v41   ;;  %vm416_vm8 = vcmask 113728  }
  0xd4   :  { %v268_v43 = vpop.permute.xlu1 %267  }
  0xd5   :  { %271 = vst.msk [vmem:[#allocation0 + $0x8] sm:$0x1] %vm269_vm10, %v268_v43   ;;  %v335_v45 = vpop.permute.xlu2 %334   ;;  %vm363_vm10 = vcmask 244928  }
  0xd6   :  { %v262_v44 = vpop.permute.xlu0 %261   ;;  %338 = vst.msk [vmem:[#allocation0 + $0x10] sm:$0x1] %vm336_vm12, %v335_v45   ;;  %vm389_vm12 = vcmask 179328  }
  0xd7   :  { %264 = vst.msk [vmem:[#allocation0] sm:$0x1] %vm263_vm11, %v262_v44   ;;  %vm436_vm11 = vcmask 64528  }
  0xdc   :  { %v288_v46 = vpop.permute.xlu1 %287  }
  0xdd   :  { %291 = vst.msk [vmem:[#allocation0 + $0x8] sm:$0x1] %vm289_vm13, %v288_v46   ;;  %v355_v48 = vpop.permute.xlu2 %354   ;;  %vm383_vm13 = vcmask 195728  }
  0xde   :  { %v282_v47 = vpop.permute.xlu0 %281   ;;  %358 = vst.msk [vmem:[#allocation0 + $0x10] sm:$0x1] %vm356_vm15, %v355_v48   ;;  %vm403_vm15 = vcmask 146528  }
  0xdf   :  { %284 = vst.msk [vmem:[#allocation0] sm:$0x1] %vm283_vm14, %v282_v47   ;;  %vm409_vm14 = vcmask 130128  }
  0xe4   :  { %v308_v49 = vpop.permute.xlu1 %307  }
  0xe5   :  { %311 = vst.msk [vmem:[#allocation0 + $0x8] sm:$0x1] %vm309_vm0, %v308_v49   ;;  %v375_v51 = vpop.permute.xlu2 %374   ;;  %vm429_vm0 = vcmask 80928  }
  0xe6   :  { %v302_v50 = vpop.permute.xlu0 %301   ;;  %378 = vst.msk [vmem:[#allocation0 + $0x10] sm:$0x1] %vm376_vm2, %v375_v51  }
  0xe7   :  { %304 = vst.msk [vmem:[#allocation0] sm:$0x1] %vm303_vm1, %v302_v50   ;;  %vm423_vm1 = vcmask 97328  }
  0xec   :  { %v328_v52 = vpop.permute.xlu1 %327  }
  0xed   :  { %331 = vst.msk [vmem:[#allocation0 + $0x8] sm:$0x1] %vm329_vm3, %v328_v52   ;;  %v395_v54 = vpop.permute.xlu2 %394  }
  0xee   :  { %v322_v53 = vpop.permute.xlu0 %321   ;;  %398 = vst.msk [vmem:[#allocation0 + $0x10] sm:$0x1] %vm396_vm5, %v395_v54  }
  0xef   :  { %324 = vst.msk [vmem:[#allocation0] sm:$0x1] %vm323_vm4, %v322_v53  }
  0xf4   :  { %v348_v55 = vpop.permute.xlu1 %347  }
  0xf5   :  { %351 = vst.msk [vmem:[#allocation0 + $0x8] sm:$0x1] %vm349_vm6, %v348_v55   ;;  %v415_v57 = vpop.permute.xlu2 %414  }
  0xf6   :  { %v342_v56 = vpop.permute.xlu0 %341   ;;  %418 = vst.msk [vmem:[#allocation0 + $0x10] sm:$0x1] %vm416_vm8, %v415_v57  }
  0xf7   :  { %344 = vst.msk [vmem:[#allocation0] sm:$0x1] %vm343_vm7, %v342_v56  }
  0xfc   :  { %v368_v58 = vpop.permute.xlu1 %367  }
  0xfd   :  { %371 = vst.msk [vmem:[#allocation0 + $0x8] sm:$0x1] %vm369_vm9, %v368_v58   ;;  %v435_v60 = vpop.permute.xlu2 %434  }
  0xfe   :  { %v362_v59 = vpop.permute.xlu0 %361   ;;  %438 = vst.msk [vmem:[#allocation0 + $0x10] sm:$0x1] %vm436_vm11, %v435_v60  }
  0xff   :  { %364 = vst.msk [vmem:[#allocation0] sm:$0x1] %vm363_vm10, %v362_v59  }
 0x104   :  { %v388_v61 = vpop.permute.xlu1 %387  }
 0x105   :  { %391 = vst.msk [vmem:[#allocation0 + $0x8] sm:$0x1] %vm389_vm12, %v388_v61   ;;  %v452_v63 = vld [vmem:[#allocation0 + $0x10] sm:$0x1] }
 0x106   :  { %v382_v62 = vpop.permute.xlu0 %381   ;;  %523 = vst [vmem:[%s872_s1 + $0x2] sm:$0x1] %v452_v63 }
 0x107   :  { %384 = vst.msk [vmem:[#allocation0] sm:$0x1] %vm383_vm13, %v382_v62  }
 0x10c   :  { %v408_v0 = vpop.permute.xlu1 %407  }
 0x10d   :  { %411 = vst.msk [vmem:[#allocation0 + $0x8] sm:$0x1] %vm409_vm14, %v408_v0  }
 0x10e   :  { %v402_v1 = vpop.permute.xlu0 %401  }
 0x10f   :  { %404 = vst.msk [vmem:[#allocation0] sm:$0x1] %vm403_vm15, %v402_v1  }
 0x114   :  { %v428_v2 = vpop.permute.xlu1 %427  }
 0x115   :  { %431 = vst.msk [vmem:[#allocation0 + $0x8] sm:$0x1] %vm429_vm0, %v428_v2  }
 0x116   :  { %v422_v3 = vpop.permute.xlu0 %421  }
 0x117   :  { %424 = vst.msk [vmem:[#allocation0] sm:$0x1] %vm423_vm1, %v422_v3  }
 0x11c   :  { %v446_v4 = vld [vmem:[#allocation0 + $0x8] sm:$0x1] }
 0x11d   :  { %522 = vst [vmem:[%s872_s1 + $0x1] sm:$0x1] %v446_v4 }
 0x11e   :  { %v441_v5 = vld [vmem:[#allocation0] sm:$0x1] }
 0x11f   :  { %444 = vst [vmem:[%s872_s1] sm:$0x1] %v441_v5 }

// kernel: tile.6
= control target key start
LH: loop header
LB: loop body
LE: loop exit
PB: predicated region body
PF: predicated region fallthrough
CT: control target
= control target key end

     0   :  { %s64_s0 = inlined_call_operand.vmem [shape: f32[6], index: 0, kind: input, shape index: {}]   ;;  %s65_s1 = inlined_call_operand.vmem [shape: f32[64,6], index: 1, kind: output, shape index: {}]  }
   0x1   :  { %v4_v0 = vld [vmem:[%s64_s0] ss:$0 sm:$0xff] }
   0x2   :  { %5 = vst [vmem:[%s65_s1] sm:$0xff] %v4_v0 }
   0x3   :  { %20 = vst [vmem:[%s65_s1 + $0x8] sm:$0xff] %v4_v0 }
   0x4   :  { %21 = vst [vmem:[%s65_s1 + $0x10] sm:$0xff] %v4_v0 }
   0x5   :  { %22 = vst [vmem:[%s65_s1 + $0x18] sm:$0xff] %v4_v0 }
   0x6   :  { %23 = vst [vmem:[%s65_s1 + $0x20] sm:$0xff] %v4_v0 }
   0x7   :  { %24 = vst [vmem:[%s65_s1 + $0x28] sm:$0xff] %v4_v0 }
   0x8   :  { %25 = vst [vmem:[%s65_s1 + $0x30] sm:$0xff] %v4_v0 }
   0x9   :  { %26 = vst [vmem:[%s65_s1 + $0x38] sm:$0xff] %v4_v0 }

// kernel: scale_objects.1
= control target key start
LH: loop header
LB: loop body
LE: loop exit
PB: predicated region body
PF: predicated region fallthrough
CT: control target
= control target key end

     0   :  { %vm20_vm0 = vcmask 1043456   ;;  %s61_s0 = inlined_call_operand.vmem [shape: f32[4,384], index: 0, kind: input, shape index: {}]   ;;  %s62_s1 = inlined_call_operand.vmem [shape: f32[1,384], index: 1, kind: input, shape index: {}]   ;;  %s63_s2 = inlined_call_operand.vmem [shape: f32[4,384], index: 2, kind: output, shape index: {}]  }
   0x1   :  { %v13_v0 = vld [vmem:[%s62_s1] sm:$0x7]  ;;  %v12_v1 = vld [vmem:[%s61_s0 + $0x8] sm:$0xf] }
   0x2   :  { %v15_v2 = vperm.slane %v13_v0, 0  ;;  %v16_v3 = vperm.slane %v13_v0, 1  ;;  %v17_v4 = vperm.slane %v13_v0, 2  ;;  %v11_v5 = vld [vmem:[%s61_s0] sm:$0xff] }
   0x4   :  { %v19_v6 = vrot.slane %v16_v3, 4  ;;  %v24_v7 = vmul.f32 %v17_v4, %v12_v1 }
   0x6   :  { %v21_v8 = vsel %vm20_vm0, %v15_v2, %v19_v6  ;;  %26 = vst [vmem:[%s63_s2 + $0x8] sm:$0xf] %v24_v7 }
   0x7   :  { %v23_v9 = vmul.f32 %v21_v8, %v11_v5 }
   0x9   :  { %25 = vst [vmem:[%s63_s2] sm:$0xff] %v23_v9 }

</bundles_post_ra>
